<compile_context>
chip_gen: v7x
topology: tpu7x:2x2x1
jax: 0.10.0
libtpu: 0.0.40
codegen_flags: <defaults>
</compile_context>

<pallas_src>
import jax
import jax.numpy as jnp
from jax.experimental import pallas as pl
from jax.experimental.pallas import tpu as pltpu

HIDDEN = 64
_VMEM_LIMIT_BYTES = 32 * 1024 * 1024    # scoped VMEM we request (safe on v5e/v6e/v7x)
_VMEM_BUDGET_BYTES = 14 * 1024 * 1024   # ~half the scoped limit reserved for our buffers
_TB_HARD_CAP = 8192                     # never exceed this many batch rows per step


def _round_up(n, m):
    return (n + m - 1) // m * m


def _pick_batch_tile(B, F):
    """VMEM-budget-driven batch tile (lane-padding aware)."""
    F_pad = _round_up(F, 128)
    H_pad = _round_up(HIDDEN, 128)
    # bytes of VMEM per batch row per grid step:
    #   x f32 double-buffered + x bf16 copy + h1/h2 f32 + h1/h2 bf16 copies
    bytes_per_row = (2 * F_pad * 4) + (F_pad * 2) + (2 * H_pad * 4) + (2 * H_pad * 2)
    tb_cap = (_VMEM_BUDGET_BYTES // bytes_per_row) // 128 * 128
    tb_cap = max(128, min(tb_cap, _TB_HARD_CAP))

    if B <= 256:
        # Tiny batch: one exact tile (block dims == full array dims, no padding).
        return B
    if B <= tb_cap:
        # Two tiles so v7x's 2 TensorCores both get work.
        return _round_up(pl.cdiv(B, 2), 128)
    # Large batch: as few, fat tiles as the VMEM budget allows; even tile count.
    n_tiles = pl.cdiv(B, tb_cap)
    if n_tiles % 2:
        n_tiles += 1
    return _round_up(pl.cdiv(B, n_tiles), 128)


def _mlp_kernel(x_ref, w1_ref, b1_ref, w2_ref, b2_ref, w3_ref, b3_ref, o_ref):
    # x tile: (TB, F). Weights/biases use constant index_maps -> VMEM resident.
    xb = x_ref[...].astype(jnp.bfloat16)             # bf16 MXU inputs, f32 accum

    # fc1 + ReLU   (Dropout(p=0.5) == identity in eval mode)
    h1 = jnp.dot(xb, w1_ref[...], preferred_element_type=jnp.float32) + b1_ref[...]
    h1 = jnp.maximum(h1, 0.0)

    # fc2 + ReLU
    h2 = jnp.dot(h1.astype(jnp.bfloat16), w2_ref[...],
                 preferred_element_type=jnp.float32) + b2_ref[...]
    h2 = jnp.maximum(h2, 0.0)

    # fc3 + sigmoid, as w3 @ h2^T (NT contraction, like q @ k^T) so the result is
    # a lane-dense (8, TB) row block; only row 0 is meaningful (w3 rows 1..7 are
    # zero padding for a sublane-aligned MXU M dim).
    logits8 = jax.lax.dot_general(
        w3_ref[...], h2.astype(jnp.bfloat16),
        dimension_numbers=(((1,), (1,)), ((), ())),
        preferred_element_type=jnp.float32)           # (8, TB)
    logits = logits8[0:1, :] + b3_ref[...]            # (1, TB)
    o_ref[...] = jax.nn.sigmoid(logits)


@jax.jit
def stock_prediction_forward(x, params):
    """x: [B, input_size] float -> [B, 1] float32 (eval-mode forward)."""
    w1, b1, w2, b2, w3, b3 = params
    B, F = x.shape
    H = w1.shape[1]

    TB = _pick_batch_tile(B, F)
    n_tiles = pl.cdiv(B, TB)    # ragged last tile allowed; no wrapper-side jnp.pad

    # bf16 weights for the MXU (tiny arrays; biases stay f32 for the f32 adds).
    w1b = w1.astype(jnp.bfloat16)
    w2b = w2.astype(jnp.bfloat16)
    w3b = jnp.pad(w3.astype(jnp.bfloat16), ((0, 8 - w3.shape[0]), (0, 0)))   # (8, H)

    param_bytes = sum(int(p.size) * p.dtype.itemsize
                      for p in (w1b, b1, w2b, b2, w3b, b3))
    cost = pl.CostEstimate(
        flops=int(2 * B * (F * H + H * H + 8 * H)),
        transcendentals=int(B),
        bytes_accessed=int(B * F * x.dtype.itemsize + B * 4 + param_bytes),
    )

    def resident(shape):
        return pl.BlockSpec(shape, lambda i: (0, 0))

    out = pl.pallas_call(
        _mlp_kernel,
        out_shape=jax.ShapeDtypeStruct((1, B), jnp.float32),
        grid=(n_tiles,),
        in_specs=[
            pl.BlockSpec((TB, F), lambda i: (i, 0)),       # x: pipelined over batch
            resident(w1b.shape), resident(b1.shape),
            resident(w2b.shape), resident(b2.shape),
            resident(w3b.shape), resident(b3.shape),
        ],
        out_specs=pl.BlockSpec((1, TB), lambda i: (0, i)),  # lane-dense output slab
        compiler_params=pltpu.CompilerParams(
            dimension_semantics=("parallel",),              # megacore split on v7x
            vmem_limit_bytes=_VMEM_LIMIT_BYTES,             # v5e default is only 16 MiB
        ),
        cost_estimate=cost,
    )(x, w1b, b1, w2b, b2, w3b, b3)

    return out.reshape(B, 1)


def init_params(key, input_size):
    """Deterministic init mimicking nn.Linear's U(-1/sqrt(fan_in), 1/sqrt(fan_in)).

    Layout: w1/w2 stored as [in, out] (transposed vs. PyTorch) so the kernel does
    x @ W; w3 kept in PyTorch's [1, 64] row layout; biases are [1, out]."""
    def linear(k, fan_in, fan_out, transpose):
        kw, kb = jax.random.split(k)
        bound = 1.0 / jnp.sqrt(jnp.float32(fan_in))
        shape = (fan_in, fan_out) if transpose else (fan_out, fan_in)
        w = jax.random.uniform(kw, shape, jnp.float32, -bound, bound)
        b = jax.random.uniform(kb, (1, fan_out), jnp.float32, -bound, bound)
        return w, b

    k1, k2, k3 = jax.random.split(key, 3)
    w1, b1 = linear(k1, input_size, HIDDEN, True)
    w2, b2 = linear(k2, HIDDEN, HIDDEN, True)
    w3, b3 = linear(k3, HIDDEN, 1, False)           # w3: (1, 64), b3: (1, 1)
    return (w1, b1, w2, b2, w3, b3)


def reference_forward(x, params):
    """Pure-JAX f32 reference (eval-mode PyTorch semantics)."""
    w1, b1, w2, b2, w3, b3 = params
    h1 = jnp.maximum(x @ w1 + b1, 0.0)
    h2 = jnp.maximum(h1 @ w2 + b2, 0.0)
    return jax.nn.sigmoid(h2 @ w3.T + b3)


if __name__ == "__main__":
    key = jax.random.PRNGKey(0)
    k_params, k_x, k_x2 = jax.random.split(key, 3)

    input_size = 16
    params = init_params(k_params, input_size)

    # Small single-tile case (batch = 8).
    batch = 8
    x = jax.random.normal(k_x, (batch, input_size), dtype=jnp.float32)
    out = jax.block_until_ready(stock_prediction_forward(x, params))
    assert out.shape == (batch, 1), out.shape
    assert bool(jnp.all((out >= 0.0) & (out <= 1.0))), "sigmoid output out of range"
    ref = reference_forward(x, params)
    assert bool(jnp.all(jnp.abs(out - ref) < 5e-2)), "mismatch vs f32 reference (B=8)"

    # Ragged multi-tile case (2 tiles, partial last block, no wrapper-side pad).
    batch2 = 300
    x2 = jax.random.normal(k_x2, (batch2, input_size), dtype=jnp.float32)
    out2 = jax.block_until_ready(stock_prediction_forward(x2, params))
    assert out2.shape == (batch2, 1), out2.shape
    ref2 = reference_forward(x2, params)
    assert bool(jnp.all(jnp.abs(out2 - ref2) < 5e-2)), "mismatch vs f32 reference (B=300)"

    print("KERNEL_OK")
</pallas_src>

<mosaic_0001>
module attributes {stable_mosaic.version = 11 : i64} {
  func.func @_mlp_kernel(%arg0: i32, %arg1: memref<8x16xf32, #tpu.memory_space<vmem>>, %arg2: memref<16x64xbf16, #tpu.memory_space<vmem>>, %arg3: memref<1x64xf32, #tpu.memory_space<vmem>>, %arg4: memref<64x64xbf16, #tpu.memory_space<vmem>>, %arg5: memref<1x64xf32, #tpu.memory_space<vmem>>, %arg6: memref<8x64xbf16, #tpu.memory_space<vmem>>, %arg7: memref<1x1xf32, #tpu.memory_space<vmem>>, %arg8: memref<1x8xf32, #tpu.memory_space<vmem>>) attributes {dimension_semantics = [#tpu.dimension_semantics<parallel>], iteration_bounds = array<i64: 1>, scalar_prefetch = 0 : i64, scratch_operands = 0 : i64, tpu.core_type = #tpu.core_type<tc>, window_params = [{transform_indices = @transform_0, window_bounds = array<i64: 8, 16>}, {pipeline_mode = #tpu.pipeline_mode<synchronous>, transform_indices = @transform_1, window_bounds = array<i64: 16, 64>}, {pipeline_mode = #tpu.pipeline_mode<synchronous>, transform_indices = @transform_2, window_bounds = array<i64: 1, 64>}, {pipeline_mode = #tpu.pipeline_mode<synchronous>, transform_indices = @transform_3, window_bounds = array<i64: 64, 64>}, {pipeline_mode = #tpu.pipeline_mode<synchronous>, transform_indices = @transform_4, window_bounds = array<i64: 1, 64>}, {pipeline_mode = #tpu.pipeline_mode<synchronous>, transform_indices = @transform_5, window_bounds = array<i64: 8, 64>}, {pipeline_mode = #tpu.pipeline_mode<synchronous>, transform_indices = @transform_6, window_bounds = array<i64: 1, 1>}, {transform_indices = @transform_7, window_bounds = array<i64: 1, 8>}]} {
    %c0 = arith.constant 0 : index
    %c0_0 = arith.constant 0 : index
    %0 = vector.load %arg1[%c0, %c0_0] : memref<8x16xf32, #tpu.memory_space<vmem>>, vector<8x16xf32>
    %1 = arith.truncf %0 : vector<8x16xf32> to vector<8x16xbf16>
    %c0_1 = arith.constant 0 : index
    %c0_2 = arith.constant 0 : index
    %2 = vector.load %arg2[%c0_1, %c0_2] : memref<16x64xbf16, #tpu.memory_space<vmem>>, vector<16x64xbf16>
    %cst = arith.constant dense<0.000000e+00> : vector<8x64xf32>
    %3 = tpu.matmul %1, %2, %cst {dimension_numbers = #tpu.dot_dimension_numbers<[1], [0], [0], [1], [0, 0, 1, 1], [], []>} : vector<8x16xbf16>, vector<16x64xbf16>, vector<8x64xf32> -> vector<8x64xf32>
    %c0_3 = arith.constant 0 : index
    %c0_4 = arith.constant 0 : index
    %4 = vector.load %arg3[%c0_3, %c0_4] : memref<1x64xf32, #tpu.memory_space<vmem>>, vector<1x64xf32>
    %5 = vector.broadcast %4 : vector<1x64xf32> to vector<8x64xf32>
    %6 = arith.addf %3, %5 : vector<8x64xf32>
    %cst_5 = arith.constant 0.000000e+00 : f32
    %7 = vector.broadcast %cst_5 : f32 to vector<8x64xf32>
    %8 = arith.maximumf %6, %7 : vector<8x64xf32>
    %9 = arith.truncf %8 : vector<8x64xf32> to vector<8x64xbf16>
    %c0_6 = arith.constant 0 : index
    %c0_7 = arith.constant 0 : index
    %10 = vector.load %arg4[%c0_6, %c0_7] : memref<64x64xbf16, #tpu.memory_space<vmem>>, vector<64x64xbf16>
    %cst_8 = arith.constant dense<0.000000e+00> : vector<8x64xf32>
    %11 = tpu.matmul %9, %10, %cst_8 {dimension_numbers = #tpu.dot_dimension_numbers<[1], [0], [0], [1], [0, 0, 1, 1], [], []>} : vector<8x64xbf16>, vector<64x64xbf16>, vector<8x64xf32> -> vector<8x64xf32>
    %c0_9 = arith.constant 0 : index
    %c0_10 = arith.constant 0 : index
    %12 = vector.load %arg5[%c0_9, %c0_10] : memref<1x64xf32, #tpu.memory_space<vmem>>, vector<1x64xf32>
    %13 = vector.broadcast %12 : vector<1x64xf32> to vector<8x64xf32>
    %14 = arith.addf %11, %13 : vector<8x64xf32>
    %cst_11 = arith.constant 0.000000e+00 : f32
    %15 = vector.broadcast %cst_11 : f32 to vector<8x64xf32>
    %16 = arith.maximumf %14, %15 : vector<8x64xf32>
    %c0_12 = arith.constant 0 : index
    %c0_13 = arith.constant 0 : index
    %17 = vector.load %arg6[%c0_12, %c0_13] : memref<8x64xbf16, #tpu.memory_space<vmem>>, vector<8x64xbf16>
    %18 = arith.truncf %16 : vector<8x64xf32> to vector<8x64xbf16>
    %cst_14 = arith.constant dense<0.000000e+00> : vector<8x8xf32>
    %19 = tpu.matmul %17, %18, %cst_14 {dimension_numbers = #tpu.dot_dimension_numbers<[1], [1], [0], [0], [0, 0, 1, 0], [], []>} : vector<8x64xbf16>, vector<8x64xbf16>, vector<8x8xf32> -> vector<8x8xf32>
    %20 = vector.extract_strided_slice %19 {offsets = [0, 0], sizes = [1, 8], strides = [1, 1]} : vector<8x8xf32> to vector<1x8xf32>
    %c0_15 = arith.constant 0 : index
    %c0_16 = arith.constant 0 : index
    %21 = vector.load %arg7[%c0_15, %c0_16] : memref<1x1xf32, #tpu.memory_space<vmem>>, vector<1x1xf32>
    %22 = vector.broadcast %21 : vector<1x1xf32> to vector<1x8xf32>
    %23 = arith.addf %20, %22 : vector<1x8xf32>
    %24 = arith.negf %23 : vector<1x8xf32>
    %25 = math.exp %24 : vector<1x8xf32>
    %cst_17 = arith.constant 1.000000e+00 : f32
    %26 = vector.broadcast %cst_17 : f32 to vector<1x8xf32>
    %27 = arith.addf %26, %25 : vector<1x8xf32>
    %28 = arith.divf %26, %27 : vector<1x8xf32>
    %c0_18 = arith.constant 0 : index
    %c0_19 = arith.constant 0 : index
    %29 = vector.load %arg8[%c0_18, %c0_19] : memref<1x8xf32, #tpu.memory_space<vmem>>, vector<1x8xf32>
    tpu.vector_store %arg8[%c0_18, %c0_19], %28 {strides = array<i32>} : memref<1x8xf32, #tpu.memory_space<vmem>>, vector<1x8xf32>,
    return
  }
  func.func @transform_0(%arg0: i32) -> (i32, i32) {
    %c0_i32 = arith.constant 0 : i32
    %c0_i32_0 = arith.constant 0 : i32
    return %arg0, %c0_i32 : i32, i32
  }
  func.func @transform_1(%arg0: i32) -> (i32, i32) {
    %c0_i32 = arith.constant 0 : i32
    %c0_i32_0 = arith.constant 0 : i32
    %c0_i32_1 = arith.constant 0 : i32
    return %c0_i32, %c0_i32_0 : i32, i32
  }
  func.func @transform_2(%arg0: i32) -> (i32, i32) {
    %c0_i32 = arith.constant 0 : i32
    %c0_i32_0 = arith.constant 0 : i32
    %c0_i32_1 = arith.constant 0 : i32
    return %c0_i32, %c0_i32_0 : i32, i32
  }
  func.func @transform_3(%arg0: i32) -> (i32, i32) {
    %c0_i32 = arith.constant 0 : i32
    %c0_i32_0 = arith.constant 0 : i32
    %c0_i32_1 = arith.constant 0 : i32
    return %c0_i32, %c0_i32_0 : i32, i32
  }
  func.func @transform_4(%arg0: i32) -> (i32, i32) {
    %c0_i32 = arith.constant 0 : i32
    %c0_i32_0 = arith.constant 0 : i32
    %c0_i32_1 = arith.constant 0 : i32
    return %c0_i32, %c0_i32_0 : i32, i32
  }
  func.func @transform_5(%arg0: i32) -> (i32, i32) {
    %c0_i32 = arith.constant 0 : i32
    %c0_i32_0 = arith.constant 0 : i32
    %c0_i32_1 = arith.constant 0 : i32
    return %c0_i32, %c0_i32_0 : i32, i32
  }
  func.func @transform_6(%arg0: i32) -> (i32, i32) {
    %c0_i32 = arith.constant 0 : i32
    %c0_i32_0 = arith.constant 0 : i32
    %c0_i32_1 = arith.constant 0 : i32
    return %c0_i32, %c0_i32_0 : i32, i32
  }
  func.func @transform_7(%arg0: i32) -> (i32, i32) {
    %c0_i32 = arith.constant 0 : i32
    %c0_i32_0 = arith.constant 0 : i32
    return %c0_i32, %arg0 : i32, i32
  }
}

</mosaic_0001>

<bundles_post_ra>
// kernel: stock_prediction_forward.1
= control target key start
LH: loop header
LB: loop body
LE: loop exit
PB: predicated region body
PF: predicated region fallthrough
CT: control target
= control target key end

     0   :  { %s429_s0 = inlined_call_operand.vmem [shape: f32[8,16], index: 0, kind: input, shape index: {}]   ;;  %s430_s1 = inlined_call_operand.vmem [shape: bf16[16,64], index: 1, kind: input, shape index: {}]   ;;  %s431_s2 = inlined_call_operand.vmem [shape: f32[1,64], index: 2, kind: input, shape index: {}]   ;;  %s432_s3 = inlined_call_operand.vmem [shape: bf16[64,64], index: 3, kind: input, shape index: {}]   ;;  %s433_s4 = inlined_call_operand.vmem [shape: f32[1,64], index: 4, kind: input, shape index: {}]   ;;  %s434_s5 = inlined_call_operand.vmem [shape: bf16[8,64], index: 5, kind: input, shape index: {}]   ;;  %s435_s6 = inlined_call_operand.<no memory space> [shape: f32[1,1], index: 6, kind: input, shape index: {}]   ;;  %s436_s7 = inlined_call_operand.hbm [shape: f32[1,8], index: 7, kind: output, shape index: {}]  }
   0x1   :  { %v12_v0 = vstv %s435_s6 }
   0x2   :  { %13 = vst [vmem:[#allocation2] sm:$0x1] %v12_v0 }
   0x3   :  { %v307_v1 = vld [vmem:[%s430_s1] sm:$0xff]   ;;  %v340_v2 = vmov 0.0   ;;  %vm47_vm0 = vcmask 130048   ;;  %vm341_vm1 = vmmov 0   ;;  %v309_v6 = vld [vmem:[%s432_s3 + $0x8] sm:$0xff]  }
   0x4   :  { %278 = vmatprep.subr.bf16.mxu0 %v340_v2  ;;  %v30_v3 = vld [vmem:[%s429_s0] sm:$0xff]  ;;  %284 = vmatprep.subr.bf16.mxu1 %v340_v2 }
   0x5   :  { %v308_v4 = vld [vmem:[%s432_s3] sm:$0xff]   ;;  %279 = vmatpush3.bf16.msra.mxu0 %v307_v1  ;;  %280 = vmatprep.mubr.msk.bf16.mxu0 %vm341_vm1, %v340_v2  ;;  %v31_v5 = vpack.c.bf16 %v30_v3, %v30_v3 }
   0x6   :  { %285 = vmatpush3.bf16.msra.mxu1 %v308_v4  ;;  %292 = vmatprep.mubr.msk.bf16.mxu1 %vm341_vm1, %v340_v2 }
   0x7   :  { %286 = vmatprep.subr.bf16.mxu1 %v340_v2  ;;  %296 = vmatprep.subr.bf16.mxu0 %v340_v2 }
   0x8   :  { %281 = vmatmul.mubr.msk.bf16.vlgmr.msra.gmra.mrb[0].mxu0 %vm47_vm0, %v31_v5 }
   0x9   :  { %14 = vsyncpa [#allocation4], 0  ;;  %298 = vmatprep.mubr.msk.bf16.mxu0 %vm341_vm1, %v340_v2  ;;  %v310_v7 = vld [vmem:[%s432_s3 + $0x10] sm:$0xff]   ;;  %v311_v8 = vld [vmem:[%s432_s3 + $0x18] sm:$0xff]   ;;  %vm132_vm2 = vcmask 523264   ;;  %v342_v18 = vmov 0   ;;  %v231_v29 = vlaneseq }
   0xa   :  { %287 = vmatpush3.bf16.msra.mxu1 %v309_v6  ;;  %v258_v9 = vld [vmem:[%s431_s2] ss:$0 sm:$0xff]  ;;  %306 = vset.pattern.permute.xlu0 %v342_v18  ;;  %vm242_vm3 = vcmask 57344  }
   0xb   :  { %288 = vmatprep.subr.bf16.mxu1 %v340_v2  ;;  %v225_v17 = vld [vmem:[#allocation2] sm:$0x1]  ;;  %v232_v30 = vshrl.u32 %v231_v29, 7 }
   0xc   :  { %228 = vperm.xlu0 %306, %v225_v17   ;;  %v261_v19 = vld [vmem:[%s433_s4] ss:$0 sm:$0xff]  ;;  %s343_s4 = smov [#allocation3]  }
   0xd   :  { %v177_v28 = vld [vmem:[%s434_s5] sm:$0xf]  ;;  %v233_v31 = vsub.s32 0, %v232_v30  ;;  %s250_s16 = sshll.u32 %s343_s4, 4  ;;  %s251_s16 = int_to_ptr.vmem [resolvable:$true] %s250_s16 }
   0xe   :  { %289 = vmatpush3.bf16.msra.mxu1 %v310_v7  ;;  %s316_s5 = scalar_lea.vmem %s251_s16, 16  ;;  %s320_s17 = scalar_lea.vmem %s251_s16, 32 }
   0xf   :  { %290 = vmatprep.subr.bf16.mxu1 %v340_v2  ;;  %p317_p0 = scmp.ne.s32.totalorder %s251_s16, %s316_s5  ;;  %p321_p1 = scmp.lt.s32.totalorder %s251_s16, %s251_s16 }
  0x10   :  { %p322_p2 = scmp.lt.s32.totalorder %s320_s17, %s316_s5 }
  0x12   :  { %291 = vmatpush3.bf16.msra.mxu1 %v311_v8  ;;  %p323_p3 = por %p322_p2, %p321_p1 }
  0x14   :  { %p324_p4 = pnand %p323_p3, %p317_p0 }
  0x8b   :  { %v229_v32 = vpop.permute.xlu0 %228 }
  0x8c   :  { %v234_v33 = vrot.slane %v229_v32, %v233_v31 }
  0xdb   :  { %v85_v10 = vpop.f32.mrb[0].mxu0 }
  0xdc   :  { %v86_v11 = vadd.f32 %v258_v9, %v85_v10  ;;  %v282_v12 = vpop.f32.mrb[1].mxu0 }
  0xdd   :  { %v88_v13 = vpop.f32.mrb[2].mxu0 }
  0xde   :  { %v91_v14 = vmax.f32 %v86_v11, 0.0  ;;  %v283_v15 = vpop.f32.mrb[3].mxu0 }
  0xe0   :  { %v92_v16 = vpack.c.bf16 %v91_v14, %v91_v14 }
  0xe2   :  { %293 = vmatmul.mubr.msk.bf16.vlgmr.msra.gmra.mrb[0].mxu1 %vm132_vm2, %v92_v16 }
 0x1b5   :  { %v170_v20 = vpop.f32.mrb[0].mxu1 }
 0x1b6   :  { %v171_v21 = vadd.f32 %v261_v19, %v170_v20  ;;  %v294_v22 = vpop.f32.mrb[1].mxu1 }
 0x1b7   :  { %v173_v23 = vpop.f32.mrb[2].mxu1 }
 0x1b8   :  { %v176_v24 = vmax.f32 %v171_v21, 0.0  ;;  %v295_v25 = vpop.f32.mrb[3].mxu1 }
 0x1ba   :  { %v178_v26 = vpack.c.bf16 %v176_v24, %v176_v24 }
 0x1bc   :  { %v183_v27 = vsel %vm132_vm2, %v178_v26, 0 }
 0x1bd   :  { %297 = vmatpush3.bf16.xpose.msra.mxu0 %v183_v27 }
 0x1c4   :  { %299 = vmatmul.mubr.msk.bf16.vlgmr.msra.gmra.mrb[4].mxu0 %vm132_vm2, %v177_v28 }
 0x297   :  { %v219_v34 = vpop.f32.mrb[4].mxu0 }
 0x298   :  { %v235_v35 = vadd.f32 %v234_v33, %v219_v34  ;;  %v300_v36 = vpop.f32.mrb[5].mxu0 }
 0x299   :  { %v222_v37 = vpop.f32.mrb[6].mxu0 }
 0x29a   :  { %v268_v38 = vmul.f32 -1.442695, %v235_v35  ;;  %v301_v39 = vpop.f32.mrb[7].mxu0 }
 0x29c   :  { %312 = vpow2.f32 %v268_v38 }
 0x2a6   :  { %v313_v40 = vpop.eup %312 }
 0x2a7   :  { %v239_v41 = vadd.f32 1.0, %v313_v40 }
 0x2a9   :  { %314 = vrcp.f32 %v239_v41 }
 0x2b3   :  { %v315_v42 = vpop.eup %314 }
 0x2b4   :  { %243 = vst.msk [vmem:[#allocation3] sm:$0x1] %vm242_vm3, %v315_v42 }
 0x2b5   :  { %327 = shalt.err (!%p324_p4)
}
 0x2b6   :  { %s328_s20 = scalar_lea.hbm %s436_s7, 16 }
 0x2b7   :  { %p329_p5 = scmp.ne.s32.totalorder %s436_s7, %s328_s20  ;;  %p332_p6 = scmp.lt.u32.totalorder %s328_s20, %s436_s7 }
 0x2b9   :  { %p334_p7 = pnand %p332_p6, %p329_p5 }
 0x2bb   :  { %337 = shalt.err (!%p334_p7)
}
 0x2bc   :  { %253 = dma.vmem_to_hbm [thread:$0]  %s251_s16, 16, %s436_s7, [#allocation4]  }
 0x2bd   :  { %338 = dma.done.wait [#allocation4], 16  }
 0x2be   :  { %339 = vsyncadd [#allocation4], 4294967280 }
 0x2bf   :  { %257 = vsyncpa [#allocation4], 1 }

</bundles_post_ra>
